<compile_context>
chip_gen: v5e
topology: v5e:2x2
jax: 0.10.0
libtpu: 0.0.40
codegen_flags: <defaults>
</compile_context>

<pallas_src>
import functools

import jax
import jax.numpy as jnp
from jax.experimental import pallas as pl
from jax.experimental.pallas import tpu as pltpu


def _round_up(n, m):
    return ((n + m - 1) // m) * m


def _mlp_kernel(x_ref,      # (bm, in_dim)                     VMEM
                w1_ref,     # (in_dim, hidden)                 VMEM (resident)
                b1_ref,     # (1, hidden)                      VMEM (resident)
                w2_ref,     # (1, hidden)  PyTorch fc2.weight  VMEM (resident)
                b2_ref,     # (1,)                             SMEM scalar
                out_ref):   # (1, bm)                          VMEM, lane-dense
    # fc1 + bias + ReLU.  Dropout is identity in eval mode.
    h = jnp.dot(x_ref[...], w1_ref[...], preferred_element_type=jnp.float32)
    h = jnp.maximum(h + b1_ref[...], 0.0)                    # (bm, hidden) f32
    # fc2: contract the hidden dim of both operands so the result is produced
    # directly as (1, bm) -- batch on lanes -> lane-dense output block,
    # unmasked vector stores, contiguous writeback DMA.
    out_row = jax.lax.dot_general(
        w2_ref[...], h,
        dimension_numbers=(((1,), (1,)), ((), ())),
        preferred_element_type=jnp.float32)                   # (1, bm)
    out_ref[...] = out_row + b2_ref[0]


@functools.partial(jax.jit, static_argnames=("block_batch",))
def simple_nn_forward(x, params, *, block_batch=8192):
    """x: (batch, input_dim) f32 or bf16 -> (batch, 1) f32."""
    batch, in_dim = x.shape
    hidden = params["w1"].shape[1]

    # ---- pick the batch tile ---------------------------------------------
    block_batch = max(128, _round_up(block_batch, 128))
    bm = min(block_batch, _round_up(batch, 128))
    if batch >= 4 * 128:
        # Prefer >= 4 grid steps so the "parallel" axis keeps both v7x
        # TensorCores busy with some pipelining each (no effect on v5e/v6e).
        bm = max(128, min(bm, _round_up(pl.cdiv(batch, 4), 128)))
    padded_batch = _round_up(batch, bm)
    n_blocks = padded_batch // bm

    if padded_batch != batch:
        # cdiv grid + wrapper-side zero padding for ragged batches; the padded
        # rows are sliced off below.
        x = jnp.pad(x, ((0, padded_batch - batch), (0, 0)))

    # ---- explicit VMEM budget (matters on v5e: 16 MiB default scoped) -----
    vmem_est = 4 * (2 * bm * in_dim                               # x (dbl-buf)
                    + 2 * 8 * bm                                  # (1,bm) out
                    + 4 * (max(in_dim, 8) + 16) * max(hidden, 128))  # weights
    vmem_limit = int(min(64 * 1024 * 1024, max(2 * vmem_est, 16 * 1024 * 1024)))

    out_row = pl.pallas_call(
        _mlp_kernel,
        out_shape=jax.ShapeDtypeStruct((1, padded_batch), jnp.float32),
        grid=(n_blocks,),
        in_specs=[
            pl.BlockSpec((bm, in_dim), lambda i: (i, 0)),       # x: row tiles
            pl.BlockSpec((in_dim, hidden), lambda i: (0, 0)),   # w1: resident
            pl.BlockSpec((1, hidden), lambda i: (0, 0)),        # b1: resident
            pl.BlockSpec((1, hidden), lambda i: (0, 0)),        # w2: resident
            pl.BlockSpec(memory_space=pltpu.MemorySpace.SMEM),  # b2: scalar
        ],
        out_specs=pl.BlockSpec((1, bm), lambda i: (0, i)),      # lane-dense
        compiler_params=pltpu.CompilerParams(
            dimension_semantics=("parallel",),
            vmem_limit_bytes=vmem_limit),
    )(x, params["w1"], params["b1"], params["w2"], params["b2"])

    # (1, padded_batch) -> (batch, 1)
    return out_row[0, :batch][:, None]


def init_params(key, input_dim, hidden_dim=64):
    """Deterministic init matching PyTorch Linear shapes."""
    keys = jax.random.split(key, 4)

    def u(k, shape, bound):
        return jax.random.uniform(k, shape, jnp.float32, -bound, bound)

    k1 = 1.0 / jnp.sqrt(input_dim)
    k2 = 1.0 / jnp.sqrt(hidden_dim)
    fc1_w = u(keys[0], (hidden_dim, input_dim), k1)   # PyTorch fc1.weight
    fc1_b = u(keys[1], (hidden_dim,), k1)             # fc1.bias
    fc2_w = u(keys[2], (1, hidden_dim), k2)           # fc2.weight (kept as-is)
    fc2_b = u(keys[3], (1,), k2)                      # fc2.bias

    return {
        "w1": fc1_w.T,           # (input_dim, hidden)
        "b1": fc1_b[None, :],    # (1, hidden)
        "w2": fc2_w,             # (1, hidden)  -- PyTorch layout
        "b2": fc2_b,             # (1,)
    }


def simple_nn_reference(x, params):
    """Pure-JAX reference of the same forward pass (for verification)."""
    h = jnp.maximum(x @ params["w1"] + params["b1"], 0.0)
    return h @ params["w2"].T + params["b2"][None, :]


if __name__ == "__main__":
    input_dim, hidden = 16, 64
    key = jax.random.PRNGKey(0)
    k_x1, k_x2, k_x3, k_p = jax.random.split(key, 4)
    params = init_params(k_p, input_dim, hidden_dim=hidden)

    # Small batch: single grid step, padded to one 128-row block.
    x_small = jax.random.normal(k_x1, (8, input_dim), jnp.float32)
    out_small = jax.block_until_ready(simple_nn_forward(x_small, params))
    ref_small = simple_nn_reference(x_small, params)
    assert out_small.shape == (8, 1), out_small.shape
    assert jnp.allclose(out_small, ref_small, atol=1e-4, rtol=1e-4)

    # Ragged batch: exercises cdiv grid + wrapper padding + multi-step
    # "parallel" pipeline (600 -> bm=256, 3 grid steps, padded to 768).
    x_med = jax.random.normal(k_x2, (600, input_dim), jnp.float32)
    out_med = jax.block_until_ready(simple_nn_forward(x_med, params))
    ref_med = simple_nn_reference(x_med, params)
    assert out_med.shape == (600, 1), out_med.shape
    assert jnp.allclose(out_med, ref_med, atol=1e-4, rtol=1e-4)

    # bf16 activations accepted as-is (halves the dominant HBM stream);
    # weights and accumulation stay f32.
    x_bf16 = jax.random.normal(k_x3, (256, input_dim), jnp.float32).astype(
        jnp.bfloat16)
    out_bf16 = jax.block_until_ready(simple_nn_forward(x_bf16, params))
    ref_bf16 = simple_nn_reference(x_bf16.astype(jnp.float32), params)
    assert out_bf16.shape == (256, 1), out_bf16.shape
    assert jnp.allclose(out_bf16, ref_bf16, atol=1e-4, rtol=1e-4)

    print("KERNEL_OK")
</pallas_src>

<mosaic_0001>
module attributes {stable_mosaic.version = 11 : i64} {
  func.func @_mlp_kernel(%arg0: i32, %arg1: memref<128x16xf32, #tpu.memory_space<vmem>>, %arg2: memref<16x64xf32, #tpu.memory_space<vmem>>, %arg3: memref<1x64xf32, #tpu.memory_space<vmem>>, %arg4: memref<1x64xf32, #tpu.memory_space<vmem>>, %arg5: memref<1xf32, #tpu.memory_space<smem>>, %arg6: memref<1x128xf32, #tpu.memory_space<vmem>>) attributes {dimension_semantics = [#tpu.dimension_semantics<parallel>], iteration_bounds = array<i64: 1>, scalar_prefetch = 0 : i64, scratch_operands = 0 : i64, tpu.core_type = #tpu.core_type<tc>, window_params = [{transform_indices = @transform_0, window_bounds = array<i64: 128, 16>}, {pipeline_mode = #tpu.pipeline_mode<synchronous>, transform_indices = @transform_1, window_bounds = array<i64: 16, 64>}, {pipeline_mode = #tpu.pipeline_mode<synchronous>, transform_indices = @transform_2, window_bounds = array<i64: 1, 64>}, {pipeline_mode = #tpu.pipeline_mode<synchronous>, transform_indices = @transform_3, window_bounds = array<i64: 1, 64>}, {transform_indices = @transform_4, window_bounds = array<i64: 1>}, {transform_indices = @transform_5, window_bounds = array<i64: 1, 128>}]} {
    %c0 = arith.constant 0 : index
    %c0_0 = arith.constant 0 : index
    %0 = vector.load %arg1[%c0, %c0_0] : memref<128x16xf32, #tpu.memory_space<vmem>>, vector<128x16xf32>
    %c0_1 = arith.constant 0 : index
    %c0_2 = arith.constant 0 : index
    %1 = vector.load %arg2[%c0_1, %c0_2] : memref<16x64xf32, #tpu.memory_space<vmem>>, vector<16x64xf32>
    %cst = arith.constant dense<0.000000e+00> : vector<128x64xf32>
    %2 = tpu.matmul %0, %1, %cst {dimension_numbers = #tpu.dot_dimension_numbers<[1], [0], [0], [1], [0, 0, 1, 1], [], []>} : vector<128x16xf32>, vector<16x64xf32>, vector<128x64xf32> -> vector<128x64xf32>
    %c0_3 = arith.constant 0 : index
    %c0_4 = arith.constant 0 : index
    %3 = vector.load %arg3[%c0_3, %c0_4] : memref<1x64xf32, #tpu.memory_space<vmem>>, vector<1x64xf32>
    %4 = vector.broadcast %3 : vector<1x64xf32> to vector<128x64xf32>
    %5 = arith.addf %2, %4 : vector<128x64xf32>
    %cst_5 = arith.constant 0.000000e+00 : f32
    %6 = vector.broadcast %cst_5 : f32 to vector<128x64xf32>
    %7 = arith.maximumf %5, %6 : vector<128x64xf32>
    %c0_6 = arith.constant 0 : index
    %c0_7 = arith.constant 0 : index
    %8 = vector.load %arg4[%c0_6, %c0_7] : memref<1x64xf32, #tpu.memory_space<vmem>>, vector<1x64xf32>
    %cst_8 = arith.constant dense<0.000000e+00> : vector<1x128xf32>
    %9 = tpu.matmul %8, %7, %cst_8 {dimension_numbers = #tpu.dot_dimension_numbers<[1], [1], [0], [0], [0, 0, 1, 0], [], []>} : vector<1x64xf32>, vector<128x64xf32>, vector<1x128xf32> -> vector<1x128xf32>
    %c0_9 = arith.constant 0 : index
    %10 = memref.load %arg5[%c0_9] : memref<1xf32, #tpu.memory_space<smem>>
    %11 = vector.broadcast %10 : f32 to vector<1x128xf32>
    %12 = arith.addf %9, %11 : vector<1x128xf32>
    %c0_10 = arith.constant 0 : index
    %c0_11 = arith.constant 0 : index
    %13 = vector.load %arg6[%c0_10, %c0_11] : memref<1x128xf32, #tpu.memory_space<vmem>>, vector<1x128xf32>
    tpu.vector_store %arg6[%c0_10, %c0_11], %12 {strides = array<i32>} : memref<1x128xf32, #tpu.memory_space<vmem>>, vector<1x128xf32>,
    return
  }
  func.func @transform_0(%arg0: i32) -> (i32, i32) {
    %c0_i32 = arith.constant 0 : i32
    %c0_i32_0 = arith.constant 0 : i32
    return %arg0, %c0_i32 : i32, i32
  }
  func.func @transform_1(%arg0: i32) -> (i32, i32) {
    %c0_i32 = arith.constant 0 : i32
    %c0_i32_0 = arith.constant 0 : i32
    %c0_i32_1 = arith.constant 0 : i32
    return %c0_i32, %c0_i32_0 : i32, i32
  }
  func.func @transform_2(%arg0: i32) -> (i32, i32) {
    %c0_i32 = arith.constant 0 : i32
    %c0_i32_0 = arith.constant 0 : i32
    %c0_i32_1 = arith.constant 0 : i32
    return %c0_i32, %c0_i32_0 : i32, i32
  }
  func.func @transform_3(%arg0: i32) -> (i32, i32) {
    %c0_i32 = arith.constant 0 : i32
    %c0_i32_0 = arith.constant 0 : i32
    %c0_i32_1 = arith.constant 0 : i32
    return %c0_i32, %c0_i32_0 : i32, i32
  }
  func.func @transform_4(%arg0: i32) -> i32 {
    %c0_i32 = arith.constant 0 : i32
    %c0_i32_0 = arith.constant 0 : i32
    return %c0_i32 : i32
  }
  func.func @transform_5(%arg0: i32) -> (i32, i32) {
    %c0_i32 = arith.constant 0 : i32
    %c0_i32_0 = arith.constant 0 : i32
    return %c0_i32, %arg0 : i32, i32
  }
}

</mosaic_0001>

<bundles_post_ra>
// kernel: simple_nn_forward.1
= control target key start
LH: loop header
LB: loop body
LE: loop exit
PB: predicated region body
PF: predicated region fallthrough
CT: control target
= control target key end

     0   :  { %vm43_vm0 = vcmask 130048   ;;  %vm176_vm1 = vcmask 523264   ;;  %s420_s1 = inlined_call_operand.vmem [shape: f32[16,64], index: 1, kind: input, shape index: {}]   ;;  %s421_s0 = inlined_call_operand.vmem [shape: f32[128,16], index: 0, kind: input, shape index: {}]   ;;  %s422_s2 = inlined_call_operand.vmem [shape: f32[1,64], index: 2, kind: input, shape index: {}]   ;;  %s423_s3 = inlined_call_operand.vmem [shape: f32[1,64], index: 3, kind: input, shape index: {}]   ;;  %s424_s4 = inlined_call_operand.<no memory space> [shape: f32[1], index: 4, kind: input, shape index: {}]   ;;  %s425_s5 = inlined_call_operand.vmem [shape: f32[1,128], index: 5, kind: output, shape index: {}]  }
   0x1   :  { %v38_v0 = vld [vmem:[%s420_s1 + $0x8] sm:$0xff]  ;;  %v37_v1 = vld [vmem:[%s420_s1] sm:$0xff]  ;;  %v27_v2 = vld [vmem:[%s421_s0 + $0x30] sm:$0xff] }
   0x2   :  { %286 = vmatpush.msra.mxu2 %v38_v0  ;;  %287 = vmatpush.msra.mxu3 %v38_v0  ;;  %v34_v3 = vld [vmem:[%s421_s0 + $0x68] sm:$0xff]  ;;  %v28_v4 = vld [vmem:[%s421_s0 + $0x38] sm:$0xff]  ;;  %v35_v5 = vld [vmem:[%s421_s0 + $0x70] sm:$0xff] }
   0x3   :  { %106 = vmatpush.msra.mxu0 %v38_v0  ;;  %v21_v6 = vld [vmem:[%s421_s0] sm:$0xff]  ;;  %v36_v8 = vld [vmem:[%s421_s0 + $0x78] sm:$0xff]  ;;  %v22_v9 = vld [vmem:[%s421_s0 + $0x8] sm:$0xff] }
   0x4   :  { %288 = vmatpush.msra.mxu2 %v37_v1  ;;  %289 = vmatpush.msra.mxu3 %v37_v1  ;;  %v29_v7 = vld [vmem:[%s421_s0 + $0x40] sm:$0xff]  ;;  %v30_v10 = vld [vmem:[%s421_s0 + $0x48] sm:$0xff]  ;;  %v23_v11 = vld [vmem:[%s421_s0 + $0x10] sm:$0xff] }
   0x5   :  { %259 = vmatmul.msk.f32.vlgmr.msra.gmra.mxu2 %vm43_vm0, %v27_v2  ;;  %266 = vmatmul.msk.f32.vlgmr.msra.gmra.mxu3 %vm43_vm0, %v34_v3  ;;  %v31_v12 = vld [vmem:[%s421_s0 + $0x50] sm:$0xff]  ;;  %v24_v13 = vld [vmem:[%s421_s0 + $0x18] sm:$0xff]  ;;  %v25_v15 = vld [vmem:[%s421_s0 + $0x20] sm:$0xff] }
   0x6   :  { %107 = vmatpush.msra.mxu0 %v37_v1  ;;  %v32_v14 = vld [vmem:[%s421_s0 + $0x58] sm:$0xff]  ;;  %v33_v16 = vld [vmem:[%s421_s0 + $0x60] sm:$0xff]  ;;  %v26_v17 = vld [vmem:[%s421_s0 + $0x28] sm:$0xff] }
   0x7   :  { %253 = vmatmul.msk.f32.vlgmr.msra.gmra.mxu0 %vm43_vm0, %v21_v6  ;;  %v290_v18 = vld [vmem:[%s422_s2] ss:$0 sm:$0xff] }
   0x8   :  { %v173_v3 = vld [vmem:[%s423_s3] sm:$0x1] }
   0xd   :  { %260 = vmatmul.msk.f32.gmra.mxu2 %vm43_vm0, %v28_v4  ;;  %267 = vmatmul.msk.f32.gmra.mxu3 %vm43_vm0, %v35_v5  ;;  %v175_v4 = vstv %s424_s4 }
   0xf   :  { %254 = vmatmul.msk.f32.gmra.mxu0 %vm43_vm0, %v22_v9 }
  0x15   :  { %261 = vmatmul.msk.f32.gmra.mxu2 %vm43_vm0, %v29_v7  ;;  %268 = vmatmul.msk.f32.gmra.mxu3 %vm43_vm0, %v36_v8 }
  0x17   :  { %255 = vmatmul.msk.f32.gmra.mxu0 %vm43_vm0, %v23_v11 }
  0x1d   :  { %262 = vmatmul.msk.f32.gmra.mxu2 %vm43_vm0, %v30_v10 }
  0x1f   :  { %256 = vmatmul.msk.f32.gmra.mxu0 %vm43_vm0, %v24_v13 }
  0x25   :  { %263 = vmatmul.msk.f32.gmra.mxu2 %vm43_vm0, %v31_v12 }
  0x27   :  { %257 = vmatmul.msk.f32.gmra.mxu0 %vm43_vm0, %v25_v15 }
  0x2d   :  { %264 = vmatmul.msk.f32.gmra.mxu2 %vm43_vm0, %v32_v14 }
  0x2f   :  { %258 = vmatmul.msk.f32.gmra.mxu0 %vm43_vm0, %v26_v17 }
  0x35   :  { %265 = vmatmul.msk.f32.gmra.mxu2 %vm43_vm0, %v33_v16 }
  0x84   :  { %v109_v29 = vpop.f32.mrf.mxu0 }
  0x85   :  { %v110_v0 = vadd.f32 %v290_v18, %v109_v29 }
  0x87   :  { %v157_v2 = vmax.f32 %v110_v0, 0.0 }
  0x88   :  { %v127_v19 = vpop.f32.mrf.mxu2  ;;  %v148_v20 = vpop.f32.mrf.mxu3 }
  0x89   :  { %v128_v21 = vadd.f32 %v290_v18, %v127_v19  ;;  %v149_v31 = vadd.f32 %v290_v18, %v148_v20 }
  0x8b   :  { %v170_v33 = vmax.f32 %v149_v31, 0.0  ;;  %v163_v55 = vmax.f32 %v128_v21, 0.0 }
  0x8c   :  { %v112_v34 = vpop.f32.mrf.mxu0 }
  0x8d   :  { %v113_v62 = vadd.f32 %v290_v18, %v112_v34 }
  0x8f   :  { %v158_v1 = vmax.f32 %v113_v62, 0.0 }
  0x90   :  { %v130_v22 = vpop.f32.mrf.mxu2  ;;  %v151_v23 = vpop.f32.mrf.mxu3 }
  0x91   :  { %v152_v26 = vadd.f32 %v290_v18, %v151_v23  ;;  %v131_v50 = vadd.f32 %v290_v18, %v130_v22 }
  0x93   :  { %v171_v30 = vmax.f32 %v152_v26, 0.0  ;;  %v164_v53 = vmax.f32 %v131_v50, 0.0 }
  0x94   :  { %v115_v37 = vpop.f32.mrf.mxu0 }
  0x95   :  { %v116_v60 = vadd.f32 %v290_v18, %v115_v37 }
  0x97   :  { %v159_v63 = vmax.f32 %v116_v60, 0.0 }
  0x98   :  { %v133_v24 = vpop.f32.mrf.mxu2  ;;  %v154_v25 = vpop.f32.mrf.mxu3 }
  0x99   :  { %v155_v27 = vadd.f32 %v290_v18, %v154_v25  ;;  %v134_v48 = vadd.f32 %v290_v18, %v133_v24 }
  0x9b   :  { %v172_v28 = vmax.f32 %v155_v27, 0.0  ;;  %v165_v51 = vmax.f32 %v134_v48, 0.0 }
  0x9c   :  { %v118_v40 = vpop.f32.mrf.mxu0 }
  0x9d   :  { %269 = vmatpush.xpose.msk.msra.mxu1 %vm176_vm1, %v172_v28  ;;  %v119_v58 = vadd.f32 %v290_v18, %v118_v40 }
  0x9f   :  { %v160_v61 = vmax.f32 %v119_v58, 0.0 }
  0xa0   :  { %v136_v32 = vpop.f32.mrf.mxu2 }
  0xa1   :  { %270 = vmatpush.xpose.msk.msra.mxu1 %vm176_vm1, %v171_v30  ;;  %v137_v45 = vadd.f32 %v290_v18, %v136_v32 }
  0xa3   :  { %v166_v49 = vmax.f32 %v137_v45, 0.0 }
  0xa4   :  { %v121_v47 = vpop.f32.mrf.mxu0 }
  0xa5   :  { %271 = vmatpush.xpose.msk.msra.mxu1 %vm176_vm1, %v170_v33  ;;  %v122_v57 = vadd.f32 %v290_v18, %v121_v47 }
  0xa7   :  { %v161_v59 = vmax.f32 %v122_v57, 0.0 }
  0xa8   :  { %v139_v35 = vpop.f32.mrf.mxu2 }
  0xa9   :  { %v140_v43 = vadd.f32 %v290_v18, %v139_v35 }
  0xab   :  { %v167_v46 = vmax.f32 %v140_v43, 0.0 }
  0xac   :  { %v124_v52 = vpop.f32.mrf.mxu0 }
  0xad   :  { %v125_v54 = vadd.f32 %v290_v18, %v124_v52 }
  0xaf   :  { %v162_v56 = vmax.f32 %v125_v54, 0.0 }
  0xb0   :  { %v142_v36 = vpop.f32.mrf.mxu2 }
  0xb1   :  { %v143_v41 = vadd.f32 %v290_v18, %v142_v36 }
  0xb3   :  { %v168_v44 = vmax.f32 %v143_v41, 0.0 }
  0xb8   :  { %v145_v38 = vpop.f32.mrf.mxu2 }
  0xb9   :  { %v146_v39 = vadd.f32 %v290_v18, %v145_v38 }
  0xbb   :  { %v169_v42 = vmax.f32 %v146_v39, 0.0 }
  0xbd   :  { %272 = vmatpush.xpose.msk.msra.mxu1 %vm176_vm1, %v169_v42 }
  0xc1   :  { %273 = vmatpush.xpose.msk.msra.mxu1 %vm176_vm1, %v168_v44 }
  0xc5   :  { %274 = vmatpush.xpose.msk.msra.mxu1 %vm176_vm1, %v167_v46 }
  0xc9   :  { %275 = vmatpush.xpose.msk.msra.mxu1 %vm176_vm1, %v166_v49 }
  0xcd   :  { %276 = vmatpush.xpose.msk.msra.mxu1 %vm176_vm1, %v165_v51 }
  0xd1   :  { %277 = vmatpush.xpose.msk.msra.mxu1 %vm176_vm1, %v164_v53 }
  0xd5   :  { %278 = vmatpush.xpose.msk.msra.mxu1 %vm176_vm1, %v163_v55 }
  0xd9   :  { %279 = vmatpush.xpose.msk.msra.mxu1 %vm176_vm1, %v162_v56 }
  0xdd   :  { %280 = vmatpush.xpose.msk.msra.mxu1 %vm176_vm1, %v161_v59 }
  0xe1   :  { %281 = vmatpush.xpose.msk.msra.mxu1 %vm176_vm1, %v160_v61 }
  0xe5   :  { %282 = vmatpush.xpose.msk.msra.mxu1 %vm176_vm1, %v159_v63 }
  0xe9   :  { %283 = vmatpush.xpose.msk.msra.mxu1 %vm176_vm1, %v158_v1 }
  0xed   :  { %284 = vmatpush.xpose.msk.msra.mxu1 %vm176_vm1, %v157_v2 }
  0xf0   :  { %285 = vmatmul.msk.f32.vlgmr.msra.gmra.mxu1 %vm176_vm1, %v173_v3 }
 0x16d   :  { %v245_v5 = vpop.f32.mrf.mxu1 }
 0x16e   :  { %v246_v6 = vadd.f32 %v245_v5, %v175_v4 }
 0x170   :  { %248 = vst [vmem:[%s425_s5] sm:$0x1] %v246_v6 }

</bundles_post_ra>
